<compile_context>
chip_gen: v7x
topology: tpu7x:2x2x1
jax: 0.10.0
libtpu: 0.0.40
codegen_flags: <defaults>
</compile_context>

<pallas_src>
import jax
import jax.numpy as jnp
from jax.experimental import pallas as pl
from jax.experimental.pallas import tpu as pltpu


# ----------------------------------------------------------------------------
# Plain-JAX glue: PyTorch-exact bilinear resize (align_corners=False), NCHW.
# Generic gather-based fallback (also used by the reference).
# ----------------------------------------------------------------------------
def _bilinear_resize_nchw(x, out_h, out_w):
    n, c, in_h, in_w = x.shape

    def src_index(out_size, in_size):
        i = jnp.arange(out_size, dtype=jnp.float32)
        scale = in_size / out_size
        src = (i + 0.5) * scale - 0.5
        src = jnp.maximum(src, 0.0)            # PyTorch clamps negative coords
        i0 = jnp.floor(src).astype(jnp.int32)
        i0 = jnp.minimum(i0, in_size - 1)
        i1 = jnp.minimum(i0 + 1, in_size - 1)
        w1 = src - i0.astype(jnp.float32)
        w0 = 1.0 - w1
        return i0, i1, w0, w1

    h0, h1, wh0, wh1 = src_index(out_h, in_h)
    w0, w1, ww0, ww1 = src_index(out_w, in_w)

    top = x[:, :, h0, :]
    bot = x[:, :, h1, :]
    rows = top * wh0[None, None, :, None] + bot * wh1[None, None, :, None]
    left = rows[:, :, :, w0]
    right = rows[:, :, :, w1]
    return left * ww0[None, None, None, :] + right * ww1[None, None, None, :]


# ----------------------------------------------------------------------------
# Structured (fusion-friendly, gather-free) exact 2x bilinear upsample,
# align_corners=False.  Matches PyTorch:
#   out[2i]   = 0.25*in[i-1] + 0.75*in[i]   (in[-1] clamped to in[0])
#   out[2i+1] = 0.75*in[i]   + 0.25*in[i+1] (in[n]  clamped to in[n-1])
# ----------------------------------------------------------------------------
def _upsample2x_bilinear_nchw(x):
    n, c, h, w = x.shape

    def up_axis_last(t):
        # t: (..., L) -> (..., 2L) along the last axis
        prev = jnp.concatenate([t[..., :1], t[..., :-1]], axis=-1)
        nxt = jnp.concatenate([t[..., 1:], t[..., -1:]], axis=-1)
        even = 0.25 * prev + 0.75 * t
        odd = 0.75 * t + 0.25 * nxt
        out = jnp.stack([even, odd], axis=-1)            # (..., L, 2)
        return out.reshape(t.shape[:-1] + (2 * t.shape[-1],))

    # width, then height (via a cheap swap of the last two axes)
    xw = up_axis_last(x)                                  # (n, c, h, 2w)
    xt = jnp.swapaxes(xw, 2, 3)                           # (n, c, 2w, h)
    xh = up_axis_last(xt)                                 # (n, c, 2w, 2h)
    return jnp.swapaxes(xh, 2, 3)                         # (n, c, 2h, 2w)


# ----------------------------------------------------------------------------
# Pallas kernel.  Tiles are (channels, pixel_tile): pixels on the LANE axis,
# so stores are lane-dense even for small channel counts.
#   skip_ref : (Cs, TP) io dtype     phi_ref : (Ci, TP) bf16
#   wsk_ref  : (Ci, Cs) bf16         wpsi_ref: (Ci, 1)  f32
#   bpsi_ref : (1, 1)   f32          out_ref : (Cs, TP) io dtype
# ----------------------------------------------------------------------------
def _attention_gate_kernel(skip_ref, phi_ref, wsk_ref, wpsi_ref, bpsi_ref,
                           out_ref):
    # theta = W_skip @ skip  -- bf16 x bf16 MXU matmul with f32 accumulation.
    skip_bf = skip_ref[...].astype(jnp.bfloat16)                 # (Cs, TP)
    theta = jnp.dot(wsk_ref[...], skip_bf,
                    preferred_element_type=jnp.float32)          # (Ci, TP)

    # b_skip + b_gate are already folded into the phi stream.
    f = jnp.maximum(theta + phi_ref[...].astype(jnp.float32), 0.0)

    # psi: 1-output 1x1 conv as a VPU multiply + sublane (XLU) reduction.
    logit = jnp.sum(f * wpsi_ref[...], axis=0, keepdims=True) + bpsi_ref[...]

    # Exact sigmoid (exp on EUP + exact divide on a (1, TP) vector).
    att = 1.0 / (1.0 + jnp.exp(-logit))                          # (1, TP) f32

    # Gate the original skip tile directly (no live f32 copy of skip).
    out_ref[...] = (skip_ref[...] * att.astype(out_ref.dtype)).astype(out_ref.dtype)


# ----------------------------------------------------------------------------
# VMEM budgeting (generation-aware, with a conservative v7x-safe fallback).
# ----------------------------------------------------------------------------
def _vmem_budgets():
    cap = None
    try:
        info = pltpu.get_tpu_info()
        cap = getattr(info, "vmem_capacity_bytes", None)
    except Exception:
        cap = None
    if not cap:
        cap = 64 * 1024 * 1024            # assume v7x-sized VMEM if unknown
    limit = min(int(cap * 0.55), 96 * 1024 * 1024)   # vmem_limit_bytes
    budget = limit // 3                               # streamed-tile budget
    return limit, budget


def _attention_gate_flat(skip3, phi3, w_skip_bf16, w_psi, b_psi):
    """skip3: (N, Cs, HW) io dtype, phi3: (N, Ci, HW) bf16 -> (N, Cs, HW)."""
    N, Cs, HW = skip3.shape
    Ci = phi3.shape[1]

    vmem_limit, stream_budget = _vmem_budgets()

    io_item = jnp.dtype(skip3.dtype).itemsize
    phi_item = jnp.dtype(phi3.dtype).itemsize

    # Per pixel-column VMEM bytes:
    #   double-buffered streams: skip-in + out (io dtype) and phi (bf16)
    stream_col = 2 * (2 * Cs * io_item + Ci * phi_item)
    #   in-kernel temporaries: bf16 skip copy, out temp, theta/phi_f32/f, att
    interm_col = Cs * 2 + Cs * 4 + 3 * Ci * 4 + 16
    bytes_per_col = stream_col + interm_col

    # Biggest lane-aligned pixel tile that fits the budget.
    if HW <= 128 or HW * bytes_per_col <= stream_budget:
        tile_p = HW
    else:
        tile_p = max(128, (stream_budget // bytes_per_col) // 128 * 128)

    # Keep >= 4 grid programs when possible (2 TensorCores on v7x, plus
    # pipeline overlap everywhere) -- but never below a 128-lane tile.
    grid_p = pl.cdiv(HW, tile_p)
    if N * grid_p < 4 and HW > 128:
        want_tiles = -(-4 // N)                       # ceil(4 / N)
        tp = -(-HW // want_tiles)                     # ceil(HW / want_tiles)
        tp = max(128, ((tp + 127) // 128) * 128)
        if tp < tile_p:
            tile_p = tp
            grid_p = pl.cdiv(HW, tile_p)

    grid = (N, grid_p)

    flops = 2 * N * HW * Ci * Cs + 5 * N * HW * Ci + 2 * N * HW * Cs
    bytes_accessed = (N * HW * (2 * Cs * io_item + Ci * phi_item)
                      + 2 * Ci * Cs + 4 * (Ci + 1))
    cost = pl.CostEstimate(flops=int(flops),
                           transcendentals=int(2 * N * HW),   # exp + divide
                           bytes_accessed=int(bytes_accessed))

    return pl.pallas_call(
        _attention_gate_kernel,
        out_shape=jax.ShapeDtypeStruct((N, Cs, HW), skip3.dtype),
        grid_spec=pltpu.PrefetchScalarGridSpec(
            num_scalar_prefetch=0,
            grid=grid,
            in_specs=[
                pl.BlockSpec((None, Cs, tile_p), lambda n, p: (n, 0, p)),  # skip
                pl.BlockSpec((None, Ci, tile_p), lambda n, p: (n, 0, p)),  # phi
                pl.BlockSpec((Ci, Cs), lambda n, p: (0, 0)),               # W_skip (bf16)
                pl.BlockSpec((Ci, 1), lambda n, p: (0, 0)),                # w_psi
                pl.BlockSpec((1, 1), lambda n, p: (0, 0)),                 # b_psi
            ],
            out_specs=pl.BlockSpec((None, Cs, tile_p), lambda n, p: (n, 0, p)),
        ),
        compiler_params=pltpu.CompilerParams(
            dimension_semantics=("parallel", "parallel"),
            vmem_limit_bytes=vmem_limit,
        ),
        cost_estimate=cost,
    )(skip3, phi3, w_skip_bf16, w_psi, b_psi)


# ----------------------------------------------------------------------------
# Module-level wrapper mirroring AttentionGate.forward (NCHW in, NCHW out).
# ----------------------------------------------------------------------------
def attention_gate(skip, gating, params):
    N, Cs, H, W = skip.shape
    gH, gW = gating.shape[2], gating.shape[3]
    Ci = params["w_skip_t"].shape[0]

    # Hoist the 1x1 W_gating conv BEFORE the bilinear upsample (exact: a
    # linear 1x1 conv commutes with bilinear resize since the interpolation
    # weights sum to 1).  Also fold b_skip into the same bias (constants pass
    # through the resize unchanged), so the kernel needs no bias add.
    bias = (params["b_gate"] + params["b_skip"]).reshape(1, Ci, 1, 1)
    phi_low = jnp.einsum("nchw,ic->nihw", gating.astype(jnp.float32),
                         params["w_gate_t"]) + bias                  # (N,Ci,gH,gW)

    if (H, W) == (2 * gH, 2 * gW):
        phi = _upsample2x_bilinear_nchw(phi_low)      # structured, gather-free
    else:
        phi = _bilinear_resize_nchw(phi_low, H, W)    # generic fallback

    # Free reshapes: data stays NCHW; phi stream stored in bf16.
    skip3 = skip.reshape(N, Cs, H * W)
    phi3 = phi.astype(jnp.bfloat16).reshape(N, Ci, H * W)

    out3 = _attention_gate_flat(skip3, phi3,
                                params["w_skip_t"].astype(jnp.bfloat16),
                                params["w_psi"], params["b_psi"])
    return out3.reshape(N, Cs, H, W)


# ----------------------------------------------------------------------------
# Pure-JAX f32 reference in the ORIGINAL PyTorch order (upsample first, then
# W_gating, separate biases, exact sigmoid).  Verifies the W_gating/bias
# hoist, the structured 2x upsample, and the kernel.
# ----------------------------------------------------------------------------
def attention_gate_ref(skip, gating, params):
    N, Cs, H, W = skip.shape
    gating_up = _bilinear_resize_nchw(gating.astype(jnp.float32), H, W)
    skip_f = skip.astype(jnp.float32)

    theta = jnp.einsum("nchw,ic->nihw", skip_f, params["w_skip_t"]) \
        + params["b_skip"].reshape(1, -1, 1, 1)
    phi = jnp.einsum("nchw,ic->nihw", gating_up, params["w_gate_t"]) \
        + params["b_gate"].reshape(1, -1, 1, 1)
    f = jnp.maximum(theta + phi, 0.0)
    att = jnp.einsum("nihw,io->nohw", f, params["w_psi"]) \
        + params["b_psi"].reshape(1, 1, 1, 1)
    att = jax.nn.sigmoid(att)
    return skip_f * att


# ----------------------------------------------------------------------------
# Deterministic parameter init (shapes per nn.Conv2d with kernel_size=1,
# stored in kernel-friendly (out_ch, in_ch) matmul form).
# ----------------------------------------------------------------------------
def init_params(key, skip_channels, gating_channels):
    inter = skip_channels // 2
    k = jax.random.split(key, 6)
    return {
        "w_skip_t": jax.random.normal(k[0], (inter, skip_channels), jnp.float32) * 0.1,
        "b_skip": jax.random.normal(k[1], (inter, 1), jnp.float32) * 0.1,
        "w_gate_t": jax.random.normal(k[2], (inter, gating_channels), jnp.float32) * 0.1,
        "b_gate": jax.random.normal(k[3], (inter, 1), jnp.float32) * 0.1,
        "w_psi": jax.random.normal(k[4], (inter, 1), jnp.float32) * 0.1,
        "b_psi": jax.random.normal(k[5], (1, 1), jnp.float32) * 0.1,
    }


# TODO(synk): the 3x3-conv / BatchNorm / ConvTranspose encoder-decoder blocks
# of AttentionUNet are left to XLA; only the AttentionGate hot path is a
# Pallas kernel here.  A further win would be fusing the 2x upsample of the
# (small) low-res phi into the kernel by keeping it resident in VMEM.

if __name__ == "__main__":
    key = jax.random.PRNGKey(0)

    # (N, skip_channels, gating_channels, skip_HW, gating_HW, tolerance)
    # Tolerances account for bf16 MXU operands / bf16 phi stream vs the f32
    # reference (mixed-precision, not a kernel bug).
    configs = [
        (2, 4, 8, 16, 8, 1e-2),      # tiny smoke test (matches AttentionGate usage)
        (1, 64, 128, 16, 8, 3e-2),   # att1-like channel counts, small spatial
    ]

    for idx, (N, Cs, Cg, H, gH, tol) in enumerate(configs):
        k_skip, k_gate, k_params = jax.random.split(jax.random.fold_in(key, idx), 3)
        skip = jax.random.normal(k_skip, (N, Cs, H, H), jnp.float32)
        gating = jax.random.normal(k_gate, (N, Cg, gH, gH), jnp.float32)
        params = init_params(k_params, Cs, Cg)

        out = jax.block_until_ready(attention_gate(skip, gating, params))
        ref = jax.block_until_ready(attention_gate_ref(skip, gating, params))

        assert out.shape == skip.shape, (out.shape, skip.shape)
        err = float(jnp.max(jnp.abs(out - ref)))
        assert err < tol, (idx, err, tol)

    print("KERNEL_OK")
</pallas_src>

<mosaic_0001>
module attributes {stable_mosaic.version = 11 : i64} {
  func.func @_attention_gate_kernel(%arg0: i32, %arg1: i32, %arg2: memref<1x4x128xf32, #tpu.memory_space<vmem>>, %arg3: memref<1x2x128xbf16, #tpu.memory_space<vmem>>, %arg4: memref<2x4xbf16, #tpu.memory_space<vmem>>, %arg5: memref<2x1xf32, #tpu.memory_space<vmem>>, %arg6: memref<1x1xf32, #tpu.memory_space<vmem>>, %arg7: memref<1x4x128xf32, #tpu.memory_space<vmem>>) attributes {dimension_semantics = [#tpu.dimension_semantics<parallel>, #tpu.dimension_semantics<parallel>], iteration_bounds = array<i64: 2, 2>, scalar_prefetch = 0 : i64, scratch_operands = 0 : i64, tpu.core_type = #tpu.core_type<tc>, window_params = [{transform_indices = @transform_0, window_bounds = array<i64: 1, 4, 128>}, {transform_indices = @transform_1, window_bounds = array<i64: 1, 2, 128>}, {pipeline_mode = #tpu.pipeline_mode<synchronous>, transform_indices = @transform_2, window_bounds = array<i64: 2, 4>}, {pipeline_mode = #tpu.pipeline_mode<synchronous>, transform_indices = @transform_3, window_bounds = array<i64: 2, 1>}, {pipeline_mode = #tpu.pipeline_mode<synchronous>, transform_indices = @transform_4, window_bounds = array<i64: 1, 1>}, {transform_indices = @transform_5, window_bounds = array<i64: 1, 4, 128>}]} {
    %c0 = arith.constant 0 : index
    %c0_0 = arith.constant 0 : index
    %c0_1 = arith.constant 0 : index
    %0 = vector.load %arg2[%c0, %c0_0, %c0_1] : memref<1x4x128xf32, #tpu.memory_space<vmem>>, vector<1x4x128xf32>
    %1 = vector.shape_cast %0 : vector<1x4x128xf32> to vector<4x128xf32>
    %2 = arith.truncf %1 : vector<4x128xf32> to vector<4x128xbf16>
    %c0_2 = arith.constant 0 : index
    %c0_3 = arith.constant 0 : index
    %3 = vector.load %arg4[%c0_2, %c0_3] : memref<2x4xbf16, #tpu.memory_space<vmem>>, vector<2x4xbf16>
    %cst = arith.constant dense<0.000000e+00> : vector<2x128xf32>
    %4 = tpu.matmul %3, %2, %cst {dimension_numbers = #tpu.dot_dimension_numbers<[1], [0], [0], [1], [0, 0, 1, 1], [], []>} : vector<2x4xbf16>, vector<4x128xbf16>, vector<2x128xf32> -> vector<2x128xf32>
    %c0_4 = arith.constant 0 : index
    %c0_5 = arith.constant 0 : index
    %c0_6 = arith.constant 0 : index
    %5 = vector.load %arg3[%c0_4, %c0_5, %c0_6] : memref<1x2x128xbf16, #tpu.memory_space<vmem>>, vector<1x2x128xbf16>
    %6 = vector.shape_cast %5 : vector<1x2x128xbf16> to vector<2x128xbf16>
    %7 = arith.extf %6 : vector<2x128xbf16> to vector<2x128xf32>
    %8 = arith.addf %4, %7 : vector<2x128xf32>
    %cst_7 = arith.constant 0.000000e+00 : f32
    %9 = vector.broadcast %cst_7 : f32 to vector<2x128xf32>
    %10 = arith.maximumf %8, %9 : vector<2x128xf32>
    %c0_8 = arith.constant 0 : index
    %c0_9 = arith.constant 0 : index
    %11 = vector.load %arg5[%c0_8, %c0_9] : memref<2x1xf32, #tpu.memory_space<vmem>>, vector<2x1xf32>
    %12 = vector.broadcast %11 : vector<2x1xf32> to vector<2x128xf32>
    %13 = arith.mulf %10, %12 : vector<2x128xf32>
    %cst_10 = arith.constant dense<0.000000e+00> : vector<128xf32>
    %14 = vector.multi_reduction <add>, %13, %cst_10 [0] : vector<2x128xf32> to vector<128xf32>
    %15 = vector.shape_cast %14 : vector<128xf32> to vector<1x128xf32>
    %c0_11 = arith.constant 0 : index
    %c0_12 = arith.constant 0 : index
    %16 = vector.load %arg6[%c0_11, %c0_12] : memref<1x1xf32, #tpu.memory_space<vmem>>, vector<1x1xf32>
    %17 = vector.broadcast %16 : vector<1x1xf32> to vector<1x128xf32>
    %18 = arith.addf %15, %17 : vector<1x128xf32>
    %cst_13 = arith.constant 0.000000e+00 : f32
    %19 = vector.broadcast %cst_13 : f32 to vector<1x128xf32>
    %20 = arith.subf %19, %18 : vector<1x128xf32>
    %21 = math.exp %20 : vector<1x128xf32>
    %cst_14 = arith.constant 1.000000e+00 : f32
    %22 = vector.broadcast %cst_14 : f32 to vector<1x128xf32>
    %23 = arith.addf %22, %21 : vector<1x128xf32>
    %cst_15 = arith.constant 1.000000e+00 : f32
    %24 = vector.broadcast %cst_15 : f32 to vector<1x128xf32>
    %25 = arith.divf %24, %23 : vector<1x128xf32>
    %c0_16 = arith.constant 0 : index
    %c0_17 = arith.constant 0 : index
    %c0_18 = arith.constant 0 : index
    %26 = vector.load %arg2[%c0_16, %c0_17, %c0_18] : memref<1x4x128xf32, #tpu.memory_space<vmem>>, vector<1x4x128xf32>
    %27 = vector.shape_cast %26 : vector<1x4x128xf32> to vector<4x128xf32>
    %28 = vector.broadcast %25 : vector<1x128xf32> to vector<4x128xf32>
    %29 = arith.mulf %27, %28 : vector<4x128xf32>
    %c0_19 = arith.constant 0 : index
    %c0_20 = arith.constant 0 : index
    %c0_21 = arith.constant 0 : index
    %30 = vector.load %arg7[%c0_19, %c0_20, %c0_21] : memref<1x4x128xf32, #tpu.memory_space<vmem>>, vector<1x4x128xf32>
    %31 = vector.shape_cast %30 : vector<1x4x128xf32> to vector<4x128xf32>
    %32 = vector.shape_cast %29 : vector<4x128xf32> to vector<1x4x128xf32>
    tpu.vector_store %arg7[%c0_19, %c0_20, %c0_21], %32 {strides = array<i32>} : memref<1x4x128xf32, #tpu.memory_space<vmem>>, vector<1x4x128xf32>,
    return
  }
  func.func @transform_0(%arg0: i32, %arg1: i32) -> (i32, i32, i32) {
    %c0_i32 = arith.constant 0 : i32
    %c0_i32_0 = arith.constant 0 : i32
    return %arg0, %c0_i32, %arg1 : i32, i32, i32
  }
  func.func @transform_1(%arg0: i32, %arg1: i32) -> (i32, i32, i32) {
    %c0_i32 = arith.constant 0 : i32
    %c0_i32_0 = arith.constant 0 : i32
    return %arg0, %c0_i32, %arg1 : i32, i32, i32
  }
  func.func @transform_2(%arg0: i32, %arg1: i32) -> (i32, i32) {
    %c0_i32 = arith.constant 0 : i32
    %c0_i32_0 = arith.constant 0 : i32
    %c0_i32_1 = arith.constant 0 : i32
    return %c0_i32, %c0_i32_0 : i32, i32
  }
  func.func @transform_3(%arg0: i32, %arg1: i32) -> (i32, i32) {
    %c0_i32 = arith.constant 0 : i32
    %c0_i32_0 = arith.constant 0 : i32
    %c0_i32_1 = arith.constant 0 : i32
    return %c0_i32, %c0_i32_0 : i32, i32
  }
  func.func @transform_4(%arg0: i32, %arg1: i32) -> (i32, i32) {
    %c0_i32 = arith.constant 0 : i32
    %c0_i32_0 = arith.constant 0 : i32
    %c0_i32_1 = arith.constant 0 : i32
    return %c0_i32, %c0_i32_0 : i32, i32
  }
  func.func @transform_5(%arg0: i32, %arg1: i32) -> (i32, i32, i32) {
    %c0_i32 = arith.constant 0 : i32
    %c0_i32_0 = arith.constant 0 : i32
    return %arg0, %c0_i32, %arg1 : i32, i32, i32
  }
}

</mosaic_0001>

<bundles_post_ra>
// kernel: tpu_custom_call.1
= control target key start
LH: loop header
LB: loop body
LE: loop exit
PB: predicated region body
PF: predicated region fallthrough
CT: control target
= control target key end

     0   :  { %s984_s0 = inlined_call_operand.hbm [shape: f32[2,4,256], index: 0, kind: input, shape index: {}]   ;;  %s985_s1 = inlined_call_operand.vmem [shape: bf16[2,2,256], index: 1, kind: input, shape index: {}]   ;;  %s986_s2 = inlined_call_operand.vmem [shape: bf16[2,4], index: 2, kind: input, shape index: {}]   ;;  %s987_s3 = inlined_call_operand.vmem [shape: f32[2,1], index: 3, kind: input, shape index: {}]   ;;  %s988_s4 = inlined_call_operand.<no memory space> [shape: f32[1,1], index: 4, kind: input, shape index: {}]   ;;  %s989_s5 = inlined_call_operand.hbm [shape: f32[2,4,256], index: 5, kind: output, shape index: {}]  }
   0x1   :  { %v10_v0 = vstv %s988_s4 }
   0x2   :  { %11 = vst [vmem:[#allocation2] sm:$0x1] %v10_v0 }
   0x3   :  { %12 = vsyncpa [#allocation4], 0 }
   0x4   :  { %14 = vsyncpa [#allocation4 + $0x1], 0 }
   0x5   :  { %15 = vsyncpa [#allocation5], 0 }
   0x6   :  { %17 = vsyncpa [#allocation5 + $0x1], 0  ;;  %s771_s20 = smov 0   ;;  %s773_s21 = smov 0  }
   0x7   :  { %s775_s22 = smov 0   ;;  %s777_s23 = smov 0  }
   0x8   :  { %s779_s24 = smov 0   ;;  %s781_s25 = smov 0  }
   0x9   :  { %s783_s26 = smov 0   ;;  %s785_s4 = smov 0  }
   0xa LB: > { %s492_s27 = sadd.s32 4294967295, %s731_s4   ;;  %s493_s28 = sadd.s32 4294967294, %s731_s4   ;;  %s731_s4 = sphi %s785_s4, %s23_s4   ;;  %s727_s26 = sphi %s783_s26, %s1009_s26   ;;  %s723_s25 = sphi %s781_s25, %s1008_s25   ;;  %s719_s24 = sphi %s779_s24, %s1007_s24   ;;  %s715_s23 = sphi %s777_s23, %s1006_s23   ;;  %s711_s22 = sphi %s775_s22, %s1005_s22   ;;  %s707_s21 = sphi %s773_s21, %s1004_s21   ;;  %s703_s20 = sphi %s771_s20, %s1003_s20  }
   0xb   : > { %s32_s29 = sadd.s32 1, %s723_s25  ;;  %s35_s30 = sadd.s32 1, %s727_s26 }
   0xc   : > { %p33_p0 = scmp.ge.s32.totalorder %s32_s29, 2  ;;  %s44_s6 = sadd.s32 1, %s711_s22 }
   0xd   : > { %p51_p1 = scmp.ne.s32.totalorder %s711_s22, %s707_s21  ;;  %p52_p2 = scmp.eq.s32.totalorder %s731_s4, 0 }
   0xe   : > { %s1011_s29 = smov (%p33_p0, %s32_s29), 0  ;;  %s1013_s30 = smov (!%p33_p0, %s35_s30), %s727_s26 }
   0xf   : > { %s40_s7 = ssub.s32 %s723_s25, %s1011_s29  ;;  %p824_p3 = por %p52_p2, %p51_p1 }
  0x10   : > { %p37_p4 = scmp.ge.s32.totalorder %s1013_s30, 2  ;;  %p57_p5 = scmp.ne.s32.totalorder %s707_s21, %s703_s20 }
  0x11   : > { %p58_p6 = scmp.eq.s32.totalorder %s492_s27, 0  ;;  %p174_p7 = scmp.eq.s32.totalorder %s492_s27, 3 }
  0x12   : > { %s1015_s30 = smov (%p37_p4, %s1013_s30), 0  ;;  %p180_p10 = scmp.eq.s32.totalorder %s493_s28, 3 }
  0x13   : > { %993 = sst [smem:[#allocation9_spill]] %s1015_s30  ;;  %p832_p8 = por %p58_p6, %p57_p5 }
  0x14   : > { %p836_p9 = por %p174_p7, %p51_p1  ;;  %s39_s11 = ssub.s32 %s727_s26, %s1015_s30 }
  0x15   : > { %s41_s12 = sor.u32 %s40_s7, %s39_s11  ;;  %p842_p12 = por %p180_p10, %p57_p5 }
  0x16   : > { %s995_s10 = scalar_select %p836_p9, 1, 0 }
  0x17   : > { %p42_p11 = scmp.eq.s32.totalorder %s41_s12, 0  ;;  %p529_p13 = scmp.lt.s32.totalorder %s731_s4, 4 }
  0x18   : > { %s996_s13 = scalar_select %p842_p12, 1, 0 }
  0x19   : > { %s209_s14 = sand.u32 1, %s711_s22   ;;  %s497_s17 = sshll.u32 %s727_s26, 1 }
  0x1a   : > { %s849_s15 = scalar_select %p42_p11, %s711_s22, %s44_s6  }
  0x1b   : > { %s496_s16 = sshll.u32 %s209_s14, 2  ;;  %s218_s18 = sadd.s32 %s723_s25, %s497_s17 }
  0x1c   : > { %s213_s19 = scalar_lea.vmem [#allocation3], %s496_s16  ;;  %s498_s30 = sshll.u32 %s218_s18, 6 }
  0x1d   : > { %s222_s27 = sshll.u32 %s213_s19, 4  ;;  %s858_s11 = scalar_lea.hbm %s984_s0, %s498_s30  ;;  %s853_s27 = int_to_ptr.vmem [resolvable:$true] %s222_s27 }
  0x1e   : > { %p862_p0 = pnand %p529_p13, %p824_p3  ;;  %s210_s12 = scalar_lea.sflag [#allocation4], %s209_s14 }
  0x1f   : > { %s603_s16 = scalar_lea.hbm %s858_s11, 64  ;;  %s608_s17 = scalar_lea.hbm %s984_s0, 256 }
  0x20   : > { %p604_p4 = scmp.ne.s32.totalorder %s858_s11, %s603_s16  ;;  %p605_p5 = pneg %p862_p0 }
  0x21   : > { %p609_p3 = scmp.lt.u32.totalorder %s858_s11, %s984_s0  ;;  %p610_p10 = scmp.lt.u32.totalorder %s608_s17, %s603_s16 }
  0x22   : > { %p606_p6 = pnand %p605_p5, %p604_p4  ;;  %p612_p13 = scmp.lt.u32.totalorder %s603_s16, %s858_s11 }
  0x23   : > { %p611_p11 = por %p610_p10, %p609_p3 }
  0x24   : > { %p607_p7 = pneg %p606_p6 }
  0x25   : > { %p613_p1 = por %p612_p13, %p611_p11 }
  0x27   : > { %p614_p2 = pnand %p613_p1, %p607_p7 }
  0x29   : > { %617 = shalt.err (!%p614_p2)
}
  0x2a   : > { %s618_s14 = scalar_lea.vmem %s853_s27, 64  ;;  %s733_s28 = smov [#allocation3]  }
  0x2b   : > { %p619_p4 = scmp.ne.s32.totalorder %s853_s27, %s618_s14  ;;  %s623_s7 = sshll.u32 %s733_s28, 4  ;;  %s624_s7 = int_to_ptr.vmem [resolvable:$false] %s623_s7 }
  0x2c   : > { %s625_s30 = scalar_lea.vmem %s624_s7, 128  ;;  %p626_p9 = scmp.lt.s32.totalorder %s853_s27, %s624_s7 }
  0x2d   : > { %p621_p6 = pnand %p619_p4, %p605_p5  ;;  %p627_p3 = scmp.lt.s32.totalorder %s625_s30, %s618_s14 }
  0x2f   : > { %p622_p12 = pneg %p621_p6  ;;  %p628_p10 = por %p627_p3, %p626_p9 }
  0x31   : > { %p629_p11 = pnand %p628_p10, %p622_p12 }
  0x33   : > { %632 = shalt.err (!%p629_p11)
}
  0x34   : > { %524 = dma.hbm_to_vmem [thread:$0]  (!%p862_p0), %s858_s11, 64, %s853_s27, %s210_s12  }
  0x35   : > { %p998_p1 = scmp.lt.s32.totalorder %s731_s4, 5  ;;  %p999_p2 = scmp.ge.s32.totalorder %s731_s4, 1 }
  0x37   : > { %p238_p5 = pnand %p999_p2, %p998_p1 }
  0x38   : > { %s898_s16 = sand.u32 (!%p238_p5), 1, %s707_s21  }
  0x39   : > { %241 = sbr.rel (%p238_p5) target bundleno = 349 (0x15d), region = 40  ;;  %s500_s8 = sshll.u32 (!%p238_p5), %s898_s16, 2 }
  0x3a   : > { %s244_s17 = scalar_lea.sflag (!%p238_p5), [#allocation4], %s898_s16  ;;  %s247_s6 = scalar_lea.vmem (!%p238_p5), [#allocation3], %s500_s8 }
  0x40   : > { %694 = dma.done.wait (%p832_p8), %s244_s17, 64  }
  0x41   : > { %696 = vsyncadd (%p832_p8), %s244_s17, 4294967232  ;;  %v734_v1 = vmov 0.0   ;;  %vm735_vm0 = vmmov 0   ;;  %v736_v2 = vmov 0   ;;  %v289_v3 = vld [vmem:[%s247_s6] sm:$0xf]  ;;  %v363_v19 = vlaneseq }
  0x42   : > { %511 = vmatprep.subr.bf16.mxu0 %v734_v1  ;;  %513 = vmatprep.mubr.msk.bf16.mxu0 %vm735_vm0, %v734_v1  ;;  %vm298_vm1 = vcmask 1041408   ;;  %v343_v4 = vld [vmem:[%s987_s3] sm:$0x3]  ;;  %v290_v5 = vpack.c.bf16 %v289_v3, %v289_v3  ;;  %vm294_vm2 = vcmask 31744   ;;  %p281_p8 = scmp.lt.s32.totalorder %s719_s24, 1  ;;  %p283_p9 = scmp.lt.s32.totalorder %s715_s23, 1 }
  0x43   : > { %598 = vset.pattern.permute.xlu0 %v736_v2  ;;  %v357_v6 = vld [vmem:[#allocation2] sm:$0x1]  ;;  %v364_v23 = vshrl.u32 %v363_v19, 7  ;;  %s505_s6 = sshll.u32 %s719_s24, 1  ;;  %s280_s9 = scalar_lea.vmem [#allocation6], %s500_s8 }
  0x44   : > { %346 = vperm.xlu0 %598, %v343_v4   ;;  %v300_v7 = vsel %vm298_vm1, %v290_v5, 0  ;;  %v291_v8 = vld [vmem:[%s986_s2] sm:$0x1]  ;;  %s282_s18 = scalar_select %p281_p8, %s719_s24, 1 }
  0x45   : > { %512 = vmatpush3.bf16.msra.mxu0 %v300_v7  ;;  %s284_s19 = scalar_select %p283_p9, %s715_s23, 1  ;;  %v365_v25 = vsub.s32 0, %v364_v23 }
  0x46   : > { %s502_s14 = sshll.u32 %s282_s18, 1  ;;  %s388_s27 = sadd.s32 %s715_s23, %s505_s6 }
  0x47   : > { %s286_s28 = sadd.s32 %s502_s14, %s284_s19  ;;  %s506_s11 = sshll.u32 %s388_s27, 6 }
  0x48   : > { %360 = vperm.xlu0 %598, %v357_v6   ;;  %514 = vmatmul.mubr.msk.bf16.vlgmr.msra.gmra.mrb[0].mxu0 %vm294_vm2, %v291_v8  ;;  %s287_s17 = scalar_lea.vmem %s985_s1, %s286_s28  ;;  %s392_s12 = sshll.u32 %s280_s9, 4  ;;  %s932_s12 = int_to_ptr.vmem [resolvable:$true] %s392_s12 }
  0x49   : > { %v292_v9 = vld [vmem:[%s287_s17] sm:$0x1]  ;;  %s930_s14 = scalar_lea.hbm %s989_s5, %s506_s11  ;;  %s377_s28 = scalar_lea.sflag [#allocation5], %s898_s16 }
  0x4a   : > { %v293_v10 = vunpack.c.l.bf16 %v292_v9  ;;  %s633_s24 = scalar_lea.vmem %s932_s12, 64  ;;  %p1000_p0 = scmp.ne.s32.totalorder %s995_s10, 0 }
  0x4b   : > { %p634_p12 = scmp.ne.s32.totalorder %s932_s12, %s633_s24  ;;  %s737_s23 = smov [#allocation6]  }
  0x4c   : > { %s637_s8 = sshll.u32 %s737_s23, 4  ;;  %s638_s8 = int_to_ptr.vmem [resolvable:$false] %s637_s8 }
  0x4d   : > { %p635_p7 = pnand %p634_p12, %p1000_p0  ;;  %s639_s7 = scalar_lea.vmem %s638_s8, 128 }
  0x4e   : > { %p640_p4 = scmp.lt.s32.totalorder %s932_s12, %s638_s8  ;;  %p641_p6 = scmp.lt.s32.totalorder %s639_s7, %s633_s24 }
  0x4f   : > { %p636_p13 = pneg %p635_p7 }
  0x50   : > { %p642_p3 = por %p641_p6, %p640_p4 }
  0x52   : > { %p643_p10 = pnand %p642_p3, %p636_p13 }
  0xc3   : > { %v347_v17 = vpop.permute.xlu0 %346 }
  0xc7   : > { %v361_v27 = vpop.permute.xlu0 %360 }
  0xc8   : > { %v366_v30 = vrot.slane %v361_v27, %v365_v25 }
 0x11b   : > { %v336_v11 = vpop.f32.mrb[0].mxu0 }
 0x11c   : > { %v337_v12 = vadd.f32 %v336_v11, %v293_v10  ;;  %v515_v13 = vpop.f32.mrb[1].mxu0 }
 0x11d   : > { %v339_v14 = vpop.f32.mrb[2].mxu0 }
 0x11e   : > { %v342_v15 = vmax.f32 %v337_v12, 0.0  ;;  %v516_v16 = vpop.f32.mrb[3].mxu0 }
 0x120   : > { %v349_v18 = vmul.f32 %v347_v17, %v342_v15 }
 0x122   : > { %v350_v20 = vsel %vm298_vm1, %v349_v18, 0.0 }
 0x123   : > { %v351_v21 = vrot.slane %v350_v20, 4 }
 0x125   : > { %v352_v22 = vadd.f32 %v351_v21, %v350_v20 }
 0x127   : > { %v353_v24 = vrot.slane %v352_v22, 2 }
 0x129   : > { %v354_v26 = vadd.f32 %v353_v24, %v352_v22 }
 0x12b   : > { %v355_v28 = vrot.slane %v354_v26, 1 }
 0x12d   : > { %v356_v29 = vadd.f32 %v355_v28, %v354_v26 }
 0x12f   : > { %v367_v31 = vadd.f32 %v366_v30, %v356_v29 }
 0x131   : > { %v368_v32 = vsub.f32 0.0, %v367_v31 }
 0x133   : > { %v369_v33 = vmul.f32 1.442695, %v368_v32 }
 0x135   : > { %599 = vpow2.f32 %v369_v33 }
 0x13f   : > { %v600_v34 = vpop.eup %599 }
 0x140   : > { %v371_v35 = vadd.f32 1.0, %v600_v34 }
 0x142   : > { %601 = vrcp.f32 %v371_v35 }
 0x14c   : > { %v602_v36 = vpop.eup %601 }
 0x14d   : > { %v374_v37 = vmul.f32 %v602_v36, %v289_v3 }
 0x14f   : > { %375 = vst [vmem:[%s280_s9] sm:$0xf] %v374_v37 }
 0x150   : > { %646 = shalt.err (!%p643_p10)
}
 0x151   : > { %s647_s16 = scalar_lea.hbm %s930_s14, 64  ;;  %s651_s6 = scalar_lea.hbm %s989_s5, 256 }
 0x152   : > { %p648_p11 = scmp.ne.s32.totalorder %s930_s14, %s647_s16  ;;  %p652_p5 = scmp.lt.u32.totalorder %s930_s14, %s989_s5 }
 0x153   : > { %p653_p8 = scmp.lt.u32.totalorder %s651_s6, %s647_s16  ;;  %p655_p12 = scmp.lt.u32.totalorder %s647_s16, %s930_s14 }
 0x154   : > { %p649_p1 = pnand %p648_p11, %p1000_p0 }
 0x155   : > { %p654_p9 = por %p653_p8, %p652_p5 }
 0x156   : > { %p650_p2 = pneg %p649_p1 }
 0x157   : > { %p656_p7 = por %p655_p12, %p654_p9 }
 0x159   : > { %p657_p13 = pnand %p656_p7, %p650_p2 }
 0x15b   : > { %660 = shalt.err (!%p657_p13)
}
 0x15c   : > { %519 = dma.vmem_to_hbm [thread:$0]  (%p1000_p0), %s932_s12, 64, %s930_s14, %s377_s28  }
 0x15d PF: > { %p530_p4 = scmp.ge.s32.totalorder %s731_s4, 2  ;;  %s404_s9 = sand.u32 1, %s703_s20  }
 0x15e   : > { %p1001_p6 = scmp.ne.s32.totalorder %s996_s13, 0  ;;  %s405_s18 = scalar_lea.sflag [#allocation5], %s404_s9 }
 0x160   : > { %p526_p3 = pnand %p530_p4, %p1001_p6 }
 0x162   : > { %698 = dma.done.wait (!%p526_p3), %s405_s18, 64  }
 0x163   : > { %700 = vsyncadd (!%p526_p3), %s405_s18, 4294967232  ;;  %s23_s4 = sadd.s32 1, %s731_s4   ;;  %s1002_s10 = sld [smem:[#allocation9_spill]] }
 0x164   : > { %p20_p10 = scmp.ge.s32.totalorder %s23_s4, 6   ;;  %s1003_s20 = smov %s707_s21 }
 0x165   : > { %s1004_s21 = smov %s711_s22  ;;  %s1005_s22 = smov %s849_s15 }
 0x166   : > { %s1006_s23 = smov %s723_s25  ;;  %s1007_s24 = smov %s727_s26 }
 0x167   : > { %s1008_s25 = smov %s1011_s29  ;;  %22 = sbr.rel (!%p20_p10) target bundleno = 10 (0xa), region = 88 }
 0x169   : > { %s1009_s26 = smov %s1002_s10 }
 0x16e   :  { %410 = vsyncpa [#allocation4], 1 }
 0x16f   :  { %412 = vsyncpa [#allocation4 + $0x1], 1 }
 0x170   :  { %413 = vsyncpa [#allocation5], 1 }
 0x171   :  { %415 = vsyncpa [#allocation5 + $0x1], 1 }

</bundles_post_ra>
